<compile_context>
chip_gen: v7x
topology: tpu7x:2x2x1
jax: 0.10.0
libtpu: 0.0.40
codegen_flags: <defaults>
</compile_context>

<pallas_src>
import jax
import jax.numpy as jnp
from jax.experimental import pallas as pl
from jax.experimental.pallas import tpu as pltpu

_MIB = 1024 * 1024


def _round_up(n, m):
    return ((n + m - 1) // m) * m


def _nchw_block_bytes(c, h, w, itemsize):
    """VMEM bytes of a (1, c, h, w) block (minor two dims padded to the (8, 128) tile)."""
    return c * _round_up(h, 8) * _round_up(w, 128) * itemsize


def _vmem_capacity_bytes():
    try:
        cap = getattr(pltpu.get_tpu_info(), "vmem_capacity_bytes", None)
        if cap:
            return int(cap)
    except Exception:
        pass
    return 64 * _MIB          # conservative (v7x-sized) fallback


def _budgets():
    cap = _vmem_capacity_bytes()
    # Fused (2N-traffic) path budget: ~40 MiB on 64 MiB parts, up to 96 MiB on 128 MiB parts.
    fused_budget = max(16 * _MIB, min(96 * _MIB, cap - 24 * _MIB))
    # Split-path x tile target (review: 4-8 MiB tiles reach ~85%+ of HBM roofline).
    split_target = 8 * _MIB if cap >= 96 * _MIB else 4 * _MIB
    return cap, fused_budget, split_target


def _param_bytes(weights):
    return sum(int(w.size) * jnp.dtype(w.dtype).itemsize for w in weights)


# ----------------------------------------------------------------------------
# Kernel bodies (all NCHW; per-slab spatial tiles, channels on sublanes for the MLPs).
# ----------------------------------------------------------------------------
def _mlp(pooled, w1_ref, b1_ref, w2_ref, b2_ref):
    """1x1 conv (C->Cr) + ReLU + 1x1 conv (Cr->C) + Sigmoid on a (C, S) pooled map."""
    h = jnp.dot(w1_ref[...], pooled, preferred_element_type=jnp.float32) + b1_ref[...]
    h = jnp.maximum(h, 0.0)
    a = jnp.dot(w2_ref[...], h, preferred_element_type=jnp.float32) + b2_ref[...]
    return jax.nn.sigmoid(a)


def _fused_kernel(x_ref,
                  w1h_ref, b1h_ref, w2h_ref, b2h_ref,
                  w1w_ref, b1w_ref, w2w_ref, b2w_ref,
                  o_ref):
    """Single-pass (2N HBM traffic) variant: whole (C, H, W) image resident in VMEM."""
    xt = x_ref[0]                                                   # (C, H, W)
    _, h_sz, w_sz = xt.shape

    # AdaptiveAvgPool2d((1, None)): mean over H; ((None, 1)): mean over W.  f32 accumulation.
    pooled_h = jnp.sum(xt, axis=1, dtype=jnp.float32) * (1.0 / h_sz)   # (C, W)
    pooled_w = jnp.sum(xt, axis=2, dtype=jnp.float32) * (1.0 / w_sz)   # (C, H)

    att_h = _mlp(pooled_h, w1h_ref, b1h_ref, w2h_ref, b2h_ref)         # (C, W)
    att_w = _mlp(pooled_w, w1w_ref, b1w_ref, w2w_ref, b2w_ref)         # (C, H)

    # Re-read x from VMEM for the streaming multiply (shorter live range, input dtype).
    xm = x_ref[0]
    out = xm * att_h.astype(xm.dtype)[:, None, :]                   # broadcast over H
    out = out * att_w.astype(xm.dtype)[:, :, None]                  # broadcast over W
    o_ref[0] = out.astype(o_ref.dtype)


def _pool_kernel(x_ref, ph_ref, pw_ref):
    """Split pass 1: per-channel-tile spatial pooling; keepdims keeps layouts natural."""
    xt = x_ref[0]                                                   # (tc, H, W)
    _, h_sz, w_sz = xt.shape
    ph_ref[0] = jnp.sum(xt, axis=1, keepdims=True, dtype=jnp.float32) * (1.0 / h_sz)  # (tc,1,W)
    pw_ref[0] = jnp.sum(xt, axis=2, keepdims=True, dtype=jnp.float32) * (1.0 / w_sz)  # (tc,H,1)


def _mlp_kernel(ph_ref, pw_ref,
                w1h_ref, b1h_ref, w2h_ref, b2h_ref,
                w1w_ref, b1w_ref, w2w_ref, b2w_ref,
                ah_ref, aw_ref):
    """Split pass 2: the two tiny 1x1-conv MLPs, one grid step per image."""
    ah_ref[0] = _mlp(ph_ref[0], w1h_ref, b1h_ref, w2h_ref, b2h_ref)    # (C, W) f32
    aw_ref[0] = _mlp(pw_ref[0], w1w_ref, b1w_ref, w2w_ref, b2w_ref)    # (C, H) f32


def _apply_kernel(x_ref, ah_ref, aw_ref, o_ref):
    """Split pass 3: out = x * att_h * att_w on channel tiles (pure streaming)."""
    xt = x_ref[0]                                                   # (tc, H, W)
    out = xt * ah_ref[0].astype(xt.dtype)                           # (tc, 1, W): sublane bcast
    out = out * aw_ref[0].astype(xt.dtype)                          # (tc, H, 1): lane bcast
    o_ref[0] = out.astype(o_ref.dtype)


# ----------------------------------------------------------------------------
# Wrappers.
# ----------------------------------------------------------------------------
def _kernel_weights(params):
    """PyTorch-style 1x1-conv params -> matmul weights; pad the reduced dim to >= 8."""
    w1h, b1h, w2h, b2h = params["w1_h"], params["b1_h"], params["w2_h"], params["b2_h"]
    w1w, b1w, w2w, b2w = params["w1_w"], params["b1_w"], params["w2_w"], params["b2_w"]
    cr = w1h.shape[0]
    crp = max(8, _round_up(cr, 8))

    def pad(w1, b1, w2):
        if cr == crp:
            return w1, b1, w2
        w1p = jnp.zeros((crp, w1.shape[1]), w1.dtype).at[:cr].set(w1)
        b1p = jnp.zeros((crp,), b1.dtype).at[:cr].set(b1)
        w2p = jnp.zeros((w2.shape[0], crp), w2.dtype).at[:, :cr].set(w2)
        return w1p, b1p, w2p

    w1h, b1h, w2h = pad(w1h, b1h, w2h)
    w1w, b1w, w2w = pad(w1w, b1w, w2w)
    weights = (w1h, b1h.reshape(-1, 1), w2h, b2h.reshape(-1, 1),
               w1w, b1w.reshape(-1, 1), w2w, b2w.reshape(-1, 1))
    return weights, crp


def _pick_c_tile(B, C, H, W, itemsize, target_bytes):
    cands = [d for d in range(8, C, 8) if C % d == 0]
    if not cands:
        return C
    tile_bytes = lambda d: _nchw_block_bytes(d, H, W, itemsize)
    fitting = [d for d in cands if tile_bytes(d) <= target_bytes]
    if fitting:
        deep = [d for d in fitting if B * (C // d) >= 4]   # keep >=4 grid steps for DMA overlap
        return max(deep) if deep else max(fitting)
    return min(cands)


def _xo_vmem_limit(tile_bytes, weights, vmem_cap):
    return int(min(vmem_cap - 16 * _MIB,
                   max(32 * _MIB, 6 * tile_bytes + _param_bytes(weights) + 8 * _MIB)))


def _coord_attn_fused(x, weights, Cr, vmem_cap):
    B, C, H, W = x.shape
    itemsize = jnp.dtype(x.dtype).itemsize
    blk = _nchw_block_bytes(C, H, W, itemsize)
    vmem_limit = _xo_vmem_limit(blk, weights, vmem_cap)

    wspecs = [pl.BlockSpec(w.shape, lambda b: (0, 0)) for w in weights]
    cost = pl.CostEstimate(
        flops=int(B * (4 * C * H * W + 4 * C * Cr * (H + W))),
        transcendentals=int(B * C * (H + W)),
        bytes_accessed=int(2 * B * C * H * W * itemsize + _param_bytes(weights)),
    )
    return pl.pallas_call(
        _fused_kernel,
        out_shape=jax.ShapeDtypeStruct((B, C, H, W), x.dtype),
        grid_spec=pltpu.PrefetchScalarGridSpec(
            num_scalar_prefetch=0,
            grid=(B,),
            in_specs=[pl.BlockSpec((1, C, H, W), lambda b: (b, 0, 0, 0))] + wspecs,
            out_specs=pl.BlockSpec((1, C, H, W), lambda b: (b, 0, 0, 0)),
        ),
        compiler_params=pltpu.CompilerParams(
            dimension_semantics=("parallel",),
            vmem_limit_bytes=vmem_limit,
        ),
        cost_estimate=cost,
    )(x, *weights)


def _coord_attn_split(x, weights, Cr, tc, vmem_cap):
    B, C, H, W = x.shape
    itemsize = jnp.dtype(x.dtype).itemsize
    nct = C // tc
    tile = _nchw_block_bytes(tc, H, W, itemsize)
    xo_limit = _xo_vmem_limit(tile, weights, vmem_cap)

    # --- Pass 1: spatial pooling per channel tile (natural keepdims layouts). ---
    pooled_h4, pooled_w4 = pl.pallas_call(
        _pool_kernel,
        out_shape=(jax.ShapeDtypeStruct((B, C, 1, W), jnp.float32),
                   jax.ShapeDtypeStruct((B, C, H, 1), jnp.float32)),
        grid_spec=pltpu.PrefetchScalarGridSpec(
            num_scalar_prefetch=0,
            grid=(B, nct),
            in_specs=[pl.BlockSpec((1, tc, H, W), lambda b, i: (b, i, 0, 0))],
            out_specs=[pl.BlockSpec((1, tc, 1, W), lambda b, i: (b, i, 0, 0)),
                       pl.BlockSpec((1, tc, H, 1), lambda b, i: (b, i, 0, 0))],
        ),
        compiler_params=pltpu.CompilerParams(
            dimension_semantics=("parallel", "parallel"),
            vmem_limit_bytes=xo_limit,
        ),
        cost_estimate=pl.CostEstimate(
            flops=int(2 * B * C * H * W),
            transcendentals=0,
            bytes_accessed=int(B * C * H * W * itemsize + 4 * B * C * (H + W)),
        ),
    )(x)

    # Rank-only reshapes of the KB-sized pooled maps are done in XLA so every Pallas
    # kernel only ever sees values in their natural layouts (no in-kernel relayouts).
    pooled_h = pooled_h4.reshape(B, C, W)
    pooled_w = pooled_w4.reshape(B, C, H)

    # --- Pass 2: the two tiny 1x1-conv MLPs. ---
    wspecs = [pl.BlockSpec(w.shape, lambda b: (0, 0)) for w in weights]
    att_h, att_w = pl.pallas_call(
        _mlp_kernel,
        out_shape=(jax.ShapeDtypeStruct((B, C, W), jnp.float32),
                   jax.ShapeDtypeStruct((B, C, H), jnp.float32)),
        grid_spec=pltpu.PrefetchScalarGridSpec(
            num_scalar_prefetch=0,
            grid=(B,),
            in_specs=[pl.BlockSpec((1, C, W), lambda b: (b, 0, 0)),
                      pl.BlockSpec((1, C, H), lambda b: (b, 0, 0))] + wspecs,
            out_specs=[pl.BlockSpec((1, C, W), lambda b: (b, 0, 0)),
                       pl.BlockSpec((1, C, H), lambda b: (b, 0, 0))],
        ),
        compiler_params=pltpu.CompilerParams(
            dimension_semantics=("parallel",),
            vmem_limit_bytes=int(min(vmem_cap - 16 * _MIB, 64 * _MIB)),
        ),
        cost_estimate=pl.CostEstimate(
            flops=int(4 * B * C * Cr * (H + W)),
            transcendentals=int(B * C * (H + W)),
            bytes_accessed=int(12 * B * C * (H + W) + _param_bytes(weights)),
        ),
    )(pooled_h, pooled_w, *weights)

    att_h4 = att_h.reshape(B, C, 1, W)
    att_w4 = att_w.reshape(B, C, H, 1)

    # --- Pass 3: out = x * att_h * att_w, pure streaming, both axes parallel. ---
    return pl.pallas_call(
        _apply_kernel,
        out_shape=jax.ShapeDtypeStruct((B, C, H, W), x.dtype),
        grid_spec=pltpu.PrefetchScalarGridSpec(
            num_scalar_prefetch=0,
            grid=(B, nct),
            in_specs=[pl.BlockSpec((1, tc, H, W), lambda b, i: (b, i, 0, 0)),
                      pl.BlockSpec((1, tc, 1, W), lambda b, i: (b, i, 0, 0)),
                      pl.BlockSpec((1, tc, H, 1), lambda b, i: (b, i, 0, 0))],
            out_specs=pl.BlockSpec((1, tc, H, W), lambda b, i: (b, i, 0, 0)),
        ),
        compiler_params=pltpu.CompilerParams(
            dimension_semantics=("parallel", "parallel"),
            vmem_limit_bytes=xo_limit,
        ),
        cost_estimate=pl.CostEstimate(
            flops=int(2 * B * C * H * W),
            transcendentals=0,
            bytes_accessed=int(2 * B * C * H * W * itemsize + 8 * B * C * (H + W)),
        ),
    )(x, att_h4, att_w4)


# Tri-state cache: None = fused variant untried, True/False = last compile outcome.
_FUSED_KERNEL_OK = None


def coordinate_attention(x, params, *, mode="auto", c_tile=None):
    """CoordinateAttention forward on NCHW input x: (B, C, H, W) -> (B, C, H, W)."""
    global _FUSED_KERNEL_OK
    B, C, H, W = x.shape
    weights, Cr = _kernel_weights(params)
    itemsize = jnp.dtype(x.dtype).itemsize
    vmem_cap, fused_budget, split_target = _budgets()

    if mode not in ("auto", "fused", "split"):
        raise ValueError(f"unknown mode: {mode}")

    def run_split():
        tc = c_tile if c_tile is not None else _pick_c_tile(B, C, H, W, itemsize, split_target)
        if C % tc != 0 or (tc != C and tc % 8 != 0):
            raise ValueError(f"c_tile={tc} must divide C={C} and be a multiple of 8 (or equal C)")
        return _coord_attn_split(x, weights, Cr, tc, vmem_cap)

    if mode == "split":
        return run_split()
    if mode == "fused":
        return _coord_attn_fused(x, weights, Cr, vmem_cap)

    # mode == "auto": use the 2N fused path when its (double-buffered in+out plus
    # temporary headroom) working set fits the generation-aware budget.
    blk = _nchw_block_bytes(C, H, W, itemsize)
    fits = (6 * blk + _param_bytes(weights)) <= fused_budget
    # At B == 1 the fused grid has a single step: no DMA/compute overlap and (on v7x) an
    # idle second TensorCore -- prefer the tiled split pipeline for large single images.
    single_image_stall = (B == 1 and blk >= 8 * _MIB)
    if fits and not single_image_stall and _FUSED_KERNEL_OK is not False:
        try:
            out = _coord_attn_fused(x, weights, Cr, vmem_cap)
            _FUSED_KERNEL_OK = True
            return out
        except Exception:
            # The fused kernel relies on a small in-kernel lane->sublane relayout for the
            # att_w broadcast; if this Mosaic build rejects it (or VMEM is exceeded), fall
            # back to the relayout-free split pipeline (correct, ~3N instead of 2N traffic).
            _FUSED_KERNEL_OK = False
    return run_split()


# ----------------------------------------------------------------------------
# Pure-JAX reference (mirrors the PyTorch forward exactly, NCHW) and params.
# ----------------------------------------------------------------------------
def _reference(x, params):
    pooled_h = jnp.mean(x, axis=2)                       # (B, C, W): mean over H
    pooled_w = jnp.mean(x, axis=3)                       # (B, C, H): mean over W

    def branch(p, w1, b1, w2, b2):
        h = jnp.einsum("rc,bcs->brs", w1, p) + b1.reshape(1, -1, 1)
        h = jnp.maximum(h, 0.0)
        a = jnp.einsum("cr,brs->bcs", w2, h) + b2.reshape(1, -1, 1)
        return jax.nn.sigmoid(a)

    att_h = branch(pooled_h, params["w1_h"], params["b1_h"], params["w2_h"], params["b2_h"])
    att_w = branch(pooled_w, params["w1_w"], params["b1_w"], params["w2_w"], params["b2_w"])
    return x * att_h[:, :, None, :] * att_w[:, :, :, None]


def init_params(key, in_channels, reduction=16):
    reduced = max(1, in_channels // reduction)
    ks = jax.random.split(key, 8)
    s1 = 1.0 / jnp.sqrt(in_channels)
    s2 = 1.0 / jnp.sqrt(reduced)
    return {
        # fc_h: Conv1x1(C->Cr), Conv1x1(Cr->C)
        "w1_h": jax.random.normal(ks[0], (reduced, in_channels), jnp.float32) * s1,
        "b1_h": jax.random.normal(ks[1], (reduced,), jnp.float32) * s1,
        "w2_h": jax.random.normal(ks[2], (in_channels, reduced), jnp.float32) * s2,
        "b2_h": jax.random.normal(ks[3], (in_channels,), jnp.float32) * s2,
        # fc_w
        "w1_w": jax.random.normal(ks[4], (reduced, in_channels), jnp.float32) * s1,
        "b1_w": jax.random.normal(ks[5], (reduced,), jnp.float32) * s1,
        "w2_w": jax.random.normal(ks[6], (in_channels, reduced), jnp.float32) * s2,
        "b2_w": jax.random.normal(ks[7], (in_channels,), jnp.float32) * s2,
    }


if __name__ == "__main__":
    B, C, H, W = 2, 4, 16, 16
    key = jax.random.PRNGKey(0)
    kx, kp = jax.random.split(key)
    x = jax.random.normal(kx, (B, C, H, W), jnp.float32)
    params = init_params(kp, in_channels=C, reduction=16)

    ref = _reference(x, params)

    # Auto path (attempts the fused 2N kernel at this size, falls back to split if needed).
    out = jax.block_until_ready(coordinate_attention(x, params))
    assert out.shape == (B, C, H, W)
    assert jnp.allclose(out, ref, atol=1e-4, rtol=1e-4), "auto path mismatch vs reference"

    # Explicitly exercise the relayout-free tiled split pipeline as well.
    out_split = jax.block_until_ready(coordinate_attention(x, params, mode="split"))
    assert jnp.allclose(out_split, ref, atol=1e-4, rtol=1e-4), "split path mismatch vs reference"

    print("KERNEL_OK")
</pallas_src>

<mosaic_0001>
module attributes {stable_mosaic.version = 11 : i64} {
  func.func @_fused_kernel(%arg0: i32, %arg1: memref<1x4x16x16xf32, #tpu.memory_space<vmem>>, %arg2: memref<8x4xf32, #tpu.memory_space<vmem>>, %arg3: memref<8x1xf32, #tpu.memory_space<vmem>>, %arg4: memref<4x8xf32, #tpu.memory_space<vmem>>, %arg5: memref<4x1xf32, #tpu.memory_space<vmem>>, %arg6: memref<8x4xf32, #tpu.memory_space<vmem>>, %arg7: memref<8x1xf32, #tpu.memory_space<vmem>>, %arg8: memref<4x8xf32, #tpu.memory_space<vmem>>, %arg9: memref<4x1xf32, #tpu.memory_space<vmem>>, %arg10: memref<1x4x16x16xf32, #tpu.memory_space<vmem>>) attributes {dimension_semantics = [#tpu.dimension_semantics<parallel>], iteration_bounds = array<i64: 2>, scalar_prefetch = 0 : i64, scratch_operands = 0 : i64, tpu.core_type = #tpu.core_type<tc>, window_params = [{transform_indices = @transform_0, window_bounds = array<i64: 1, 4, 16, 16>}, {pipeline_mode = #tpu.pipeline_mode<synchronous>, transform_indices = @transform_1, window_bounds = array<i64: 8, 4>}, {pipeline_mode = #tpu.pipeline_mode<synchronous>, transform_indices = @transform_2, window_bounds = array<i64: 8, 1>}, {pipeline_mode = #tpu.pipeline_mode<synchronous>, transform_indices = @transform_3, window_bounds = array<i64: 4, 8>}, {pipeline_mode = #tpu.pipeline_mode<synchronous>, transform_indices = @transform_4, window_bounds = array<i64: 4, 1>}, {pipeline_mode = #tpu.pipeline_mode<synchronous>, transform_indices = @transform_5, window_bounds = array<i64: 8, 4>}, {pipeline_mode = #tpu.pipeline_mode<synchronous>, transform_indices = @transform_6, window_bounds = array<i64: 8, 1>}, {pipeline_mode = #tpu.pipeline_mode<synchronous>, transform_indices = @transform_7, window_bounds = array<i64: 4, 8>}, {pipeline_mode = #tpu.pipeline_mode<synchronous>, transform_indices = @transform_8, window_bounds = array<i64: 4, 1>}, {transform_indices = @transform_9, window_bounds = array<i64: 1, 4, 16, 16>}]} {
    %c0 = arith.constant 0 : index
    %c0_0 = arith.constant 0 : index
    %c0_1 = arith.constant 0 : index
    %c0_2 = arith.constant 0 : index
    %0 = vector.load %arg1[%c0, %c0_0, %c0_1, %c0_2] : memref<1x4x16x16xf32, #tpu.memory_space<vmem>>, vector<1x4x16x16xf32>
    %1 = vector.shape_cast %0 : vector<1x4x16x16xf32> to vector<4x16x16xf32>
    %cst = arith.constant dense<0.000000e+00> : vector<4x16xf32>
    %2 = vector.multi_reduction <add>, %1, %cst [1] : vector<4x16x16xf32> to vector<4x16xf32>
    %cst_3 = arith.constant 6.250000e-02 : f32
    %3 = vector.broadcast %cst_3 : f32 to vector<4x16xf32>
    %4 = arith.mulf %2, %3 : vector<4x16xf32>
    %cst_4 = arith.constant dense<0.000000e+00> : vector<4x16xf32>
    %5 = vector.multi_reduction <add>, %1, %cst_4 [2] : vector<4x16x16xf32> to vector<4x16xf32>
    %cst_5 = arith.constant 6.250000e-02 : f32
    %6 = vector.broadcast %cst_5 : f32 to vector<4x16xf32>
    %7 = arith.mulf %5, %6 : vector<4x16xf32>
    %c0_6 = arith.constant 0 : index
    %c0_7 = arith.constant 0 : index
    %8 = vector.load %arg2[%c0_6, %c0_7] : memref<8x4xf32, #tpu.memory_space<vmem>>, vector<8x4xf32>
    %cst_8 = arith.constant dense<0.000000e+00> : vector<8x16xf32>
    %9 = tpu.matmul %8, %4, %cst_8 {dimension_numbers = #tpu.dot_dimension_numbers<[1], [0], [0], [1], [0, 0, 1, 1], [], []>} : vector<8x4xf32>, vector<4x16xf32>, vector<8x16xf32> -> vector<8x16xf32>
    %c0_9 = arith.constant 0 : index
    %c0_10 = arith.constant 0 : index
    %10 = vector.load %arg3[%c0_9, %c0_10] : memref<8x1xf32, #tpu.memory_space<vmem>>, vector<8x1xf32>
    %11 = vector.broadcast %10 : vector<8x1xf32> to vector<8x16xf32>
    %12 = arith.addf %9, %11 : vector<8x16xf32>
    %cst_11 = arith.constant 0.000000e+00 : f32
    %13 = vector.broadcast %cst_11 : f32 to vector<8x16xf32>
    %14 = arith.maximumf %12, %13 : vector<8x16xf32>
    %c0_12 = arith.constant 0 : index
    %c0_13 = arith.constant 0 : index
    %15 = vector.load %arg4[%c0_12, %c0_13] : memref<4x8xf32, #tpu.memory_space<vmem>>, vector<4x8xf32>
    %cst_14 = arith.constant dense<0.000000e+00> : vector<4x16xf32>
    %16 = tpu.matmul %15, %14, %cst_14 {dimension_numbers = #tpu.dot_dimension_numbers<[1], [0], [0], [1], [0, 0, 1, 1], [], []>} : vector<4x8xf32>, vector<8x16xf32>, vector<4x16xf32> -> vector<4x16xf32>
    %c0_15 = arith.constant 0 : index
    %c0_16 = arith.constant 0 : index
    %17 = vector.load %arg5[%c0_15, %c0_16] : memref<4x1xf32, #tpu.memory_space<vmem>>, vector<4x1xf32>
    %18 = vector.broadcast %17 : vector<4x1xf32> to vector<4x16xf32>
    %19 = arith.addf %16, %18 : vector<4x16xf32>
    %20 = arith.negf %19 : vector<4x16xf32>
    %21 = math.exp %20 : vector<4x16xf32>
    %cst_17 = arith.constant 1.000000e+00 : f32
    %22 = vector.broadcast %cst_17 : f32 to vector<4x16xf32>
    %23 = arith.addf %22, %21 : vector<4x16xf32>
    %24 = arith.divf %22, %23 : vector<4x16xf32>
    %c0_18 = arith.constant 0 : index
    %c0_19 = arith.constant 0 : index
    %25 = vector.load %arg6[%c0_18, %c0_19] : memref<8x4xf32, #tpu.memory_space<vmem>>, vector<8x4xf32>
    %cst_20 = arith.constant dense<0.000000e+00> : vector<8x16xf32>
    %26 = tpu.matmul %25, %7, %cst_20 {dimension_numbers = #tpu.dot_dimension_numbers<[1], [0], [0], [1], [0, 0, 1, 1], [], []>} : vector<8x4xf32>, vector<4x16xf32>, vector<8x16xf32> -> vector<8x16xf32>
    %c0_21 = arith.constant 0 : index
    %c0_22 = arith.constant 0 : index
    %27 = vector.load %arg7[%c0_21, %c0_22] : memref<8x1xf32, #tpu.memory_space<vmem>>, vector<8x1xf32>
    %28 = vector.broadcast %27 : vector<8x1xf32> to vector<8x16xf32>
    %29 = arith.addf %26, %28 : vector<8x16xf32>
    %cst_23 = arith.constant 0.000000e+00 : f32
    %30 = vector.broadcast %cst_23 : f32 to vector<8x16xf32>
    %31 = arith.maximumf %29, %30 : vector<8x16xf32>
    %c0_24 = arith.constant 0 : index
    %c0_25 = arith.constant 0 : index
    %32 = vector.load %arg8[%c0_24, %c0_25] : memref<4x8xf32, #tpu.memory_space<vmem>>, vector<4x8xf32>
    %cst_26 = arith.constant dense<0.000000e+00> : vector<4x16xf32>
    %33 = tpu.matmul %32, %31, %cst_26 {dimension_numbers = #tpu.dot_dimension_numbers<[1], [0], [0], [1], [0, 0, 1, 1], [], []>} : vector<4x8xf32>, vector<8x16xf32>, vector<4x16xf32> -> vector<4x16xf32>
    %c0_27 = arith.constant 0 : index
    %c0_28 = arith.constant 0 : index
    %34 = vector.load %arg9[%c0_27, %c0_28] : memref<4x1xf32, #tpu.memory_space<vmem>>, vector<4x1xf32>
    %35 = vector.broadcast %34 : vector<4x1xf32> to vector<4x16xf32>
    %36 = arith.addf %33, %35 : vector<4x16xf32>
    %37 = arith.negf %36 : vector<4x16xf32>
    %38 = math.exp %37 : vector<4x16xf32>
    %cst_29 = arith.constant 1.000000e+00 : f32
    %39 = vector.broadcast %cst_29 : f32 to vector<4x16xf32>
    %40 = arith.addf %39, %38 : vector<4x16xf32>
    %41 = arith.divf %39, %40 : vector<4x16xf32>
    %c0_30 = arith.constant 0 : index
    %c0_31 = arith.constant 0 : index
    %c0_32 = arith.constant 0 : index
    %c0_33 = arith.constant 0 : index
    %42 = vector.load %arg1[%c0_30, %c0_31, %c0_32, %c0_33] : memref<1x4x16x16xf32, #tpu.memory_space<vmem>>, vector<1x4x16x16xf32>
    %43 = vector.shape_cast %42 : vector<1x4x16x16xf32> to vector<4x16x16xf32>
    %44 = vector.shape_cast %24 : vector<4x16xf32> to vector<4x1x16xf32>
    %45 = vector.broadcast %44 : vector<4x1x16xf32> to vector<4x16x16xf32>
    %46 = arith.mulf %43, %45 : vector<4x16x16xf32>
    %47 = vector.shape_cast %41 : vector<4x16xf32> to vector<4x16x1xf32>
    %48 = vector.broadcast %47 : vector<4x16x1xf32> to vector<4x16x16xf32>
    %49 = arith.mulf %46, %48 : vector<4x16x16xf32>
    %c0_34 = arith.constant 0 : index
    %c0_35 = arith.constant 0 : index
    %c0_36 = arith.constant 0 : index
    %c0_37 = arith.constant 0 : index
    %50 = vector.load %arg10[%c0_34, %c0_35, %c0_36, %c0_37] : memref<1x4x16x16xf32, #tpu.memory_space<vmem>>, vector<1x4x16x16xf32>
    %51 = vector.shape_cast %50 : vector<1x4x16x16xf32> to vector<4x16x16xf32>
    %52 = vector.shape_cast %49 : vector<4x16x16xf32> to vector<1x4x16x16xf32>
    tpu.vector_store %arg10[%c0_34, %c0_35, %c0_36, %c0_37], %52 {strides = array<i32>} : memref<1x4x16x16xf32, #tpu.memory_space<vmem>>, vector<1x4x16x16xf32>,
    return
  }
  func.func @transform_0(%arg0: i32) -> (i32, i32, i32, i32) {
    %c0_i32 = arith.constant 0 : i32
    %c0_i32_0 = arith.constant 0 : i32
    %c0_i32_1 = arith.constant 0 : i32
    %c0_i32_2 = arith.constant 0 : i32
    return %arg0, %c0_i32, %c0_i32_0, %c0_i32_1 : i32, i32, i32, i32
  }
  func.func @transform_1(%arg0: i32) -> (i32, i32) {
    %c0_i32 = arith.constant 0 : i32
    %c0_i32_0 = arith.constant 0 : i32
    %c0_i32_1 = arith.constant 0 : i32
    return %c0_i32, %c0_i32_0 : i32, i32
  }
  func.func @transform_2(%arg0: i32) -> (i32, i32) {
    %c0_i32 = arith.constant 0 : i32
    %c0_i32_0 = arith.constant 0 : i32
    %c0_i32_1 = arith.constant 0 : i32
    return %c0_i32, %c0_i32_0 : i32, i32
  }
  func.func @transform_3(%arg0: i32) -> (i32, i32) {
    %c0_i32 = arith.constant 0 : i32
    %c0_i32_0 = arith.constant 0 : i32
    %c0_i32_1 = arith.constant 0 : i32
    return %c0_i32, %c0_i32_0 : i32, i32
  }
  func.func @transform_4(%arg0: i32) -> (i32, i32) {
    %c0_i32 = arith.constant 0 : i32
    %c0_i32_0 = arith.constant 0 : i32
    %c0_i32_1 = arith.constant 0 : i32
    return %c0_i32, %c0_i32_0 : i32, i32
  }
  func.func @transform_5(%arg0: i32) -> (i32, i32) {
    %c0_i32 = arith.constant 0 : i32
    %c0_i32_0 = arith.constant 0 : i32
    %c0_i32_1 = arith.constant 0 : i32
    return %c0_i32, %c0_i32_0 : i32, i32
  }
  func.func @transform_6(%arg0: i32) -> (i32, i32) {
    %c0_i32 = arith.constant 0 : i32
    %c0_i32_0 = arith.constant 0 : i32
    %c0_i32_1 = arith.constant 0 : i32
    return %c0_i32, %c0_i32_0 : i32, i32
  }
  func.func @transform_7(%arg0: i32) -> (i32, i32) {
    %c0_i32 = arith.constant 0 : i32
    %c0_i32_0 = arith.constant 0 : i32
    %c0_i32_1 = arith.constant 0 : i32
    return %c0_i32, %c0_i32_0 : i32, i32
  }
  func.func @transform_8(%arg0: i32) -> (i32, i32) {
    %c0_i32 = arith.constant 0 : i32
    %c0_i32_0 = arith.constant 0 : i32
    %c0_i32_1 = arith.constant 0 : i32
    return %c0_i32, %c0_i32_0 : i32, i32
  }
  func.func @transform_9(%arg0: i32) -> (i32, i32, i32, i32) {
    %c0_i32 = arith.constant 0 : i32
    %c0_i32_0 = arith.constant 0 : i32
    %c0_i32_1 = arith.constant 0 : i32
    %c0_i32_2 = arith.constant 0 : i32
    return %arg0, %c0_i32, %c0_i32_0, %c0_i32_1 : i32, i32, i32, i32
  }
}

module attributes {stable_mosaic.version = 11 : i64} {
  func.func @_pool_kernel(%arg0: i32, %arg1: i32, %arg2: memref<1x4x16x16xf32, #tpu.memory_space<vmem>>, %arg3: memref<1x4x1x16xf32, #tpu.memory_space<vmem>>, %arg4: memref<1x4x16x1xf32, #tpu.memory_space<vmem>>) attributes {dimension_semantics = [#tpu.dimension_semantics<parallel>, #tpu.dimension_semantics<parallel>], iteration_bounds = array<i64: 2, 1>, scalar_prefetch = 0 : i64, scratch_operands = 0 : i64, tpu.core_type = #tpu.core_type<tc>, window_params = [{transform_indices = @transform_0, window_bounds = array<i64: 1, 4, 16, 16>}, {transform_indices = @transform_1, window_bounds = array<i64: 1, 4, 1, 16>}, {transform_indices = @transform_2, window_bounds = array<i64: 1, 4, 16, 1>}]} {
    %c0 = arith.constant 0 : index
    %c0_0 = arith.constant 0 : index
    %c0_1 = arith.constant 0 : index
    %c0_2 = arith.constant 0 : index
    %0 = vector.load %arg2[%c0, %c0_0, %c0_1, %c0_2] : memref<1x4x16x16xf32, #tpu.memory_space<vmem>>, vector<1x4x16x16xf32>
    %1 = vector.shape_cast %0 : vector<1x4x16x16xf32> to vector<4x16x16xf32>
    %cst = arith.constant dense<0.000000e+00> : vector<4x16xf32>
    %2 = vector.multi_reduction <add>, %1, %cst [1] : vector<4x16x16xf32> to vector<4x16xf32>
    %3 = vector.shape_cast %2 : vector<4x16xf32> to vector<4x1x16xf32>
    %cst_3 = arith.constant 6.250000e-02 : f32
    %4 = vector.broadcast %cst_3 : f32 to vector<4x1x16xf32>
    %5 = arith.mulf %3, %4 : vector<4x1x16xf32>
    %c0_4 = arith.constant 0 : index
    %c0_5 = arith.constant 0 : index
    %c0_6 = arith.constant 0 : index
    %c0_7 = arith.constant 0 : index
    %6 = vector.load %arg3[%c0_4, %c0_5, %c0_6, %c0_7] : memref<1x4x1x16xf32, #tpu.memory_space<vmem>>, vector<1x4x1x16xf32>
    %7 = vector.shape_cast %6 : vector<1x4x1x16xf32> to vector<4x1x16xf32>
    %8 = vector.shape_cast %5 : vector<4x1x16xf32> to vector<1x4x1x16xf32>
    tpu.vector_store %arg3[%c0_4, %c0_5, %c0_6, %c0_7], %8 {strides = array<i32>} : memref<1x4x1x16xf32, #tpu.memory_space<vmem>>, vector<1x4x1x16xf32>,
    %cst_8 = arith.constant dense<0.000000e+00> : vector<4x16xf32>
    %9 = vector.multi_reduction <add>, %1, %cst_8 [2] : vector<4x16x16xf32> to vector<4x16xf32>
    %10 = vector.shape_cast %9 : vector<4x16xf32> to vector<4x16x1xf32>
    %cst_9 = arith.constant 6.250000e-02 : f32
    %11 = vector.broadcast %cst_9 : f32 to vector<4x16x1xf32>
    %12 = arith.mulf %10, %11 : vector<4x16x1xf32>
    %c0_10 = arith.constant 0 : index
    %c0_11 = arith.constant 0 : index
    %c0_12 = arith.constant 0 : index
    %c0_13 = arith.constant 0 : index
    %13 = vector.load %arg4[%c0_10, %c0_11, %c0_12, %c0_13] : memref<1x4x16x1xf32, #tpu.memory_space<vmem>>, vector<1x4x16x1xf32>
    %14 = vector.shape_cast %13 : vector<1x4x16x1xf32> to vector<4x16x1xf32>
    %15 = vector.shape_cast %12 : vector<4x16x1xf32> to vector<1x4x16x1xf32>
    tpu.vector_store %arg4[%c0_10, %c0_11, %c0_12, %c0_13], %15 {strides = array<i32>} : memref<1x4x16x1xf32, #tpu.memory_space<vmem>>, vector<1x4x16x1xf32>,
    return
  }
  func.func @transform_0(%arg0: i32, %arg1: i32) -> (i32, i32, i32, i32) {
    %c0_i32 = arith.constant 0 : i32
    %c0_i32_0 = arith.constant 0 : i32
    %c0_i32_1 = arith.constant 0 : i32
    return %arg0, %arg1, %c0_i32, %c0_i32_0 : i32, i32, i32, i32
  }
  func.func @transform_1(%arg0: i32, %arg1: i32) -> (i32, i32, i32, i32) {
    %c0_i32 = arith.constant 0 : i32
    %c0_i32_0 = arith.constant 0 : i32
    %c0_i32_1 = arith.constant 0 : i32
    return %arg0, %arg1, %c0_i32, %c0_i32_0 : i32, i32, i32, i32
  }
  func.func @transform_2(%arg0: i32, %arg1: i32) -> (i32, i32, i32, i32) {
    %c0_i32 = arith.constant 0 : i32
    %c0_i32_0 = arith.constant 0 : i32
    %c0_i32_1 = arith.constant 0 : i32
    return %arg0, %arg1, %c0_i32, %c0_i32_0 : i32, i32, i32, i32
  }
}

</mosaic_0001>

<bundles_post_ra>
// kernel: tpu_custom_call.1
= control target key start
LH: loop header
LB: loop body
LE: loop exit
PB: predicated region body
PF: predicated region fallthrough
CT: control target
= control target key end

     0   :  { %14 = vsyncpa [#allocation3], 0  ;;  %s1580_s0 = inlined_call_operand.hbm [shape: f32[2,4,16,16], index: 0, kind: input, shape index: {}]   ;;  %s1581_s1 = inlined_call_operand.vmem [shape: f32[8,4], index: 1, kind: input, shape index: {}]   ;;  %s1582_s2 = inlined_call_operand.vmem [shape: f32[8,1], index: 2, kind: input, shape index: {}]   ;;  %s1583_s3 = inlined_call_operand.vmem [shape: f32[4,8], index: 3, kind: input, shape index: {}]   ;;  %s1584_s4 = inlined_call_operand.vmem [shape: f32[4,1], index: 4, kind: input, shape index: {}]   ;;  %s1585_s5 = inlined_call_operand.vmem [shape: f32[8,4], index: 5, kind: input, shape index: {}]   ;;  %s1586_s6 = inlined_call_operand.vmem [shape: f32[8,1], index: 6, kind: input, shape index: {}]   ;;  %s1587_s7 = inlined_call_operand.vmem [shape: f32[4,8], index: 7, kind: input, shape index: {}]   ;;  %s1588_s8 = inlined_call_operand.vmem [shape: f32[4,1], index: 8, kind: input, shape index: {}]   ;;  %s1589_s9 = inlined_call_operand.hbm [shape: f32[2,4,16,16], index: 9, kind: output, shape index: {}]  }
   0x1   :  { %16 = vsyncpa [#allocation3 + $0x1], 0 }
   0x2   :  { %17 = vsyncpa [#allocation4], 0 }
   0x3   :  { %19 = vsyncpa [#allocation4 + $0x1], 0  ;;  %s1300_s30 = smov 0   ;;  %s1302_s10 = smov 0  }
   0x4   :  { %s1304_s11 = smov 0   ;;  %s1306_s12 = smov 0  }
   0x5 LB: > { %s1321_s13 = sadd.s32 4294967295, %s1238_s12   ;;  %s1026_s14 = sadd.s32 4294967294, %s1238_s12   ;;  %s1238_s12 = sphi %s1306_s12, %s1602_s12   ;;  %s1234_s11 = sphi %s1304_s11, %s1601_s11   ;;  %s1230_s10 = sphi %s1302_s10, %s1600_s10   ;;  %s1226_s30 = sphi %s1300_s30, %s1599_s30  }
   0x6   : > { %s1325_s15 = sadd.s32 1, %s1238_s12   ;;  %s32_s16 = sadd.s32 1, %s1234_s11 }
   0x7   : > { %s29_s17 = ssub.s32 %s1238_s12, %s1325_s15  ;;  %p39_p0 = scmp.ne.s32.totalorder %s1234_s11, %s1230_s10 }
   0x8   : > { %p30_p1 = scmp.eq.s32.totalorder %s29_s17, 0  ;;  %p40_p2 = scmp.eq.s32.totalorder %s1238_s12, 0 }
   0x9   : > { %p45_p3 = scmp.ne.s32.totalorder %s1230_s10, %s1226_s30  ;;  %p46_p4 = scmp.eq.s32.totalorder %s1321_s13, 0 }
   0xa   : > { %s1337_s18 = scalar_select %p30_p1, %s1234_s11, %s32_s16  }
   0xb   : > { %p1339_p5 = por %p40_p2, %p39_p0  ;;  %p1343_p6 = por %p46_p4, %p45_p3 }
   0xc   : > { %p237_p7 = scmp.eq.s32.totalorder %s1321_s13, 1  ;;  %p243_p8 = scmp.eq.s32.totalorder %s1026_s14, 1 }
   0xd   : > { %p1090_p10 = scmp.lt.s32.totalorder %s1238_s12, 2  ;;  %s287_s23 = sand.u32 1, %s1234_s11  }
   0xe   : > { %p1350_p11 = por %p237_p7, %p39_p0  ;;  %p1354_p12 = por %p243_p8, %p45_p3 }
   0xf   : > { %s1048_s24 = sshll.u32 %s1238_s12, 10  ;;  %s1029_s25 = sshll.u32 %s287_s23, 6 }
  0x10   : > { %s1593_s21 = scalar_select %p1350_p11, 1, 0 }
  0x11   : > { %s1594_s22 = scalar_select %p1354_p12, 1, 0 }
  0x12   : > { %s1363_s28 = scalar_lea.hbm %s1580_s0, %s1048_s24  ;;  %s291_s29 = scalar_lea.vmem [#allocation2], %s1029_s25 }
  0x13   : > { %s298_s14 = sshll.u32 %s291_s29, 4  ;;  %p1367_p13 = pnand %p1090_p10, %p1339_p5  ;;  %s1371_s14 = int_to_ptr.vmem [resolvable:$true] %s298_s14 }
  0x14   : > { %s1373_s17 = scalar_lea.sflag [#allocation3], %s287_s23  ;;  %s1142_s26 = scalar_lea.hbm %s1363_s28, 1024 }
  0x15   : > { %p1143_p0 = scmp.ne.s32.totalorder %s1363_s28, %s1142_s26  ;;  %p1144_p1 = pneg %p1367_p13 }
  0x16   : > { %s1147_s25 = scalar_lea.hbm %s1580_s0, 2048  ;;  %p1148_p4 = scmp.lt.u32.totalorder %s1363_s28, %s1580_s0 }
  0x17   : > { %p1145_p2 = pnand %p1144_p1, %p1143_p0  ;;  %p1149_p5 = scmp.lt.u32.totalorder %s1147_s25, %s1142_s26 }
  0x18   : > { %p1151_p8 = scmp.lt.u32.totalorder %s1142_s26, %s1363_s28 }
  0x19   : > { %p1146_p3 = pneg %p1145_p2  ;;  %p1150_p7 = por %p1149_p5, %p1148_p4 }
  0x1b   : > { %p1152_p10 = por %p1151_p8, %p1150_p7 }
  0x1d   : > { %p1153_p9 = pnand %p1152_p10, %p1146_p3 }
  0x1f   : > { %1156 = shalt.err (!%p1153_p9)
}
  0x20   : > { %s1157_s23 = scalar_lea.vmem %s1371_s14, 1024  ;;  %s1240_s24 = smov [#allocation2]  }
  0x21   : > { %p1158_p0 = scmp.ne.s32.totalorder %s1371_s14, %s1157_s23  ;;  %s1162_s19 = sshll.u32 %s1240_s24, 4  ;;  %s1163_s19 = int_to_ptr.vmem [resolvable:$false] %s1162_s19 }
  0x22   : > { %s1164_s27 = scalar_lea.vmem %s1163_s19, 2048  ;;  %p1165_p11 = scmp.lt.s32.totalorder %s1371_s14, %s1163_s19 }
  0x23   : > { %p1160_p2 = pnand %p1158_p0, %p1144_p1  ;;  %p1166_p4 = scmp.lt.s32.totalorder %s1164_s27, %s1157_s23 }
  0x25   : > { %p1161_p12 = pneg %p1160_p2  ;;  %p1167_p5 = por %p1166_p4, %p1165_p11 }
  0x27   : > { %p1168_p7 = pnand %p1167_p5, %p1161_p12 }
  0x29   : > { %1171 = shalt.err (!%p1168_p7)
}
  0x2a   : > { %s1241_s26 = smov 128   ;;  %s1242_s25 = smov 8  }
  0x2b   : > { %1085 = dma.hbm_to_vmem [thread:$0]  (!%p1367_p13), %s1363_s28, 1024, %s1371_s14, %s1373_s17, %s1241_s26, %s1241_s26, %s1242_s25  }
  0x2c   : > { %p1032_p9 = scmp.ge.s32.totalorder %s1238_s12, 1  ;;  %p306_p1 = scmp.lt.s32.totalorder %s1238_s12, 3 }
  0x2e   : > { %p307_p3 = pnand %p1032_p9, %p306_p1 }
  0x2f   : > { %s1404_s29 = sand.u32 (!%p307_p3), 1, %s1230_s10  }
  0x30   : > { %310 = sbr.rel (%p307_p3) target bundleno = 832 (0x340), region = 56  ;;  %s1033_s23 = sshll.u32 (!%p307_p3), %s1404_s29, 6 }
  0x31   : > { %s313_s24 = scalar_lea.sflag (!%p307_p3), [#allocation3], %s1404_s29  ;;  %s316_s19 = scalar_lea.vmem (!%p307_p3), [#allocation2], %s1033_s23 }
  0x37   : > { %1217 = dma.done.wait (%p1343_p6), %s313_s24, 1024  }
  0x38   : > { %1219 = vsyncadd (%p1343_p6), %s313_s24, 4294966272  ;;  %v1243_v0 = vmov 0.0   ;;  %vm1244_vm0 = vmmov 0   ;;  %v1245_v1 = vmov 0   ;;  %vm359_vm1 = vcmask 130048   ;;  %v1420_v2 = vld [vmem:[%s316_s19 + $0x10] sm:$0xff] }
  0x39   : > { %1058 = vmatprep.subr.mxu0 %v1243_v0  ;;  %1063 = vmatprep.subr.mxu1 %v1243_v0  ;;  %v1422_v3 = vld [vmem:[%s316_s19] sm:$0xff]  ;;  %v1424_v4 = vld [vmem:[%s316_s19 + $0x18] sm:$0xff]  ;;  %v369_v5 = vsel %vm359_vm1, %v1420_v2, 0.0  ;;  %v1432_v8 = vld [vmem:[%s316_s19 + $0x8] sm:$0xff]  ;;  %vm435_vm2 = vcmask 1041409   ;;  %vm437_vm3 = vcmask 1042434   ;;  %v621_v58 = vlaneseq }
  0x3a   : > { %1060 = vmatprep.mubr.msk.f32.mxu0 %vm1244_vm0, %v1243_v0  ;;  %1065 = vmatprep.mubr.msk.f32.mxu1 %vm1244_vm0, %v1243_v0  ;;  %v360_v6 = vsel %vm359_vm1, %v1422_v3, 0.0  ;;  %v370_v7 = vsel %vm359_vm1, %v1424_v4, 0.0  ;;  %v1434_v9 = vld [vmem:[%s316_s19 + $0x28] sm:$0xff]  ;;  %v1436_v10 = vld [vmem:[%s316_s19 + $0x20] sm:$0xff]  ;;  %v361_v12 = vsel %vm359_vm1, %v1432_v8, 0.0  ;;  %v1444_v15 = vld [vmem:[%s316_s19 + $0x38] sm:$0xff] }
  0x3b   : > { %1132 = vset.pattern.permute.xlu0 %v1245_v1  ;;  %1133 = vset.pattern.permute.xlu1 %v1245_v1  ;;  %v371_v11 = vadd.f32 %v370_v7, %v369_v5  ;;  %v379_v13 = vsel %vm359_vm1, %v1434_v9, 0.0  ;;  %v378_v14 = vsel %vm359_vm1, %v1436_v10, 0.0  ;;  %v1446_v16 = vld [vmem:[%s316_s19 + $0x30] sm:$0xff]  ;;  %v362_v17 = vadd.f32 %v361_v12, %v360_v6  ;;  %v424_v52 = vld [vmem:[%s1581_s1] sm:$0xff]  ;;  %s1505_s26 = scalar_lea.vmem [#allocation5], %s1033_s23  ;;  %s1049_s23 = sshll.u32 %s1321_s13, 10 }
  0x3c   : > { %404 = vadd.xlane.f32.xlu1 %v369_v5  ;;  %400 = vadd.xlane.f32.xlu0 %v360_v6  ;;  %v380_v18 = vadd.f32 %v379_v13, %v378_v14  ;;  %v388_v19 = vsel %vm359_vm1, %v1444_v15, 0.0  ;;  %v387_v20 = vsel %vm359_vm1, %v1446_v16, 0.0  ;;  %vm439_vm4 = vcmask 1043459   ;;  %v425_v54 = vld [vmem:[%s1582_s2] sm:$0xff]  ;;  %s953_s25 = sshll.u32 %s1505_s26, 4  ;;  %s1532_s20 = scalar_lea.hbm %s1589_s9, %s1049_s23  ;;  %s1534_s25 = int_to_ptr.vmem [resolvable:$true] %s953_s25 }
  0x3d   : > { %v372_v21 = vrot.slane %v371_v11, 4  ;;  %v389_v22 = vadd.f32 %v388_v19, %v387_v20  ;;  %v363_v23 = vrot.slane %v362_v17, 4  ;;  %vm445_vm5 = vcmask 1043456   ;;  %v607_v55 = vld [vmem:[%s1586_s6] sm:$0xff]  ;;  %s940_s13 = scalar_lea.sflag [#allocation4], %s1404_s29  ;;  %s1172_s28 = scalar_lea.vmem %s1534_s25, 1024 }
  0x3e   : > { %v381_v24 = vrot.slane %v380_v18, 4  ;;  %vm441_vm6 = vcmask 31744   ;;  %v741_v56 = vld [vmem:[%s1588_s8] sm:$0xf]  ;;  %v622_v59 = vand.u32 127, %v621_v58  ;;  %v1475_v63 = vshrl.u32 %v621_v58, 7  ;;  %p1173_p6 = scmp.ne.s32.totalorder %s1534_s25, %s1172_s28 }
  0x3f   : > { %v373_v25 = vadd.f32 %v372_v21, %v371_v11  ;;  %v390_v26 = vrot.slane %v389_v22, 4  ;;  %v364_v27 = vadd.f32 %v363_v23, %v362_v17  ;;  %v520_v57 = vld [vmem:[%s1584_s4] sm:$0xf]  ;;  %vm632_vm7 = vcmask 130112   ;;  %p1596_p11 = scmp.ne.s32.totalorder %s1593_s21, 0  ;;  %s1247_s14 = smov [#allocation5]  }
  0x40   : > { %406 = vadd.xlane.f32.xlu1 %v370_v7  ;;  %402 = vadd.xlane.f32.xlu0 %v361_v12  ;;  %v382_v28 = vadd.f32 %v381_v24, %v380_v18  ;;  %v627_v62 = vadd.s32 4294967288, %v622_v59  ;;  %v625_v12 = vsub.s32 %v622_v59, %v1475_v63  ;;  %vm526_vm8 = vcmask 64512   ;;  %s1176_s16 = sshll.u32 %s1247_s14, 4  ;;  %s1177_s16 = int_to_ptr.vmem [resolvable:$false] %s1176_s16 }
  0x41   : > { %v374_v29 = vrot.slane %v373_v25, 2  ;;  %v391_v30 = vadd.f32 %v390_v26, %v389_v22  ;;  %v365_v31 = vrot.slane %v364_v27, 2  ;;  %p1174_p12 = pnand %p1173_p6, %p1596_p11  ;;  %s1178_s17 = scalar_lea.vmem %s1177_s16, 2048 }
  0x42   : > { %v383_v32 = vrot.slane %v382_v28, 2  ;;  %v630_v6 = vsub.s32 %v627_v62, %v1475_v63  ;;  %v853_v62 = vsub.s32 0, %v1475_v63  ;;  %p1179_p8 = scmp.lt.s32.totalorder %s1534_s25, %s1177_s16  ;;  %p1180_p10 = scmp.lt.s32.totalorder %s1178_s17, %s1172_s28 }
  0x43   : > { %v375_v33 = vadd.f32 %v374_v29, %v373_v25  ;;  %v392_v34 = vrot.slane %v391_v30, 2  ;;  %v366_v35 = vadd.f32 %v365_v31, %v364_v27  ;;  %p1175_p13 = pneg %p1174_p12 }
  0x44   : > { %410 = vadd.xlane.f32.xlu1 %v379_v13  ;;  %408 = vadd.xlane.f32.xlu0 %v378_v14  ;;  %v384_v36 = vadd.f32 %v383_v32, %v382_v28  ;;  %p1181_p0 = por %p1180_p10, %p1179_p8 }
  0x45   : > { %v376_v37 = vrot.slane %v375_v33, 1  ;;  %v393_v38 = vadd.f32 %v392_v34, %v391_v30  ;;  %v367_v39 = vrot.slane %v366_v35, 1 }
  0x46   : > { %v385_v40 = vrot.slane %v384_v36, 1  ;;  %p1182_p2 = pnand %p1181_p0, %p1175_p13 }
  0x47   : > { %v377_v41 = vadd.f32 %v376_v37, %v375_v33  ;;  %v394_v42 = vrot.slane %v393_v38, 1  ;;  %v368_v43 = vadd.f32 %v367_v39, %v366_v35  ;;  %v606_v39 = vld [vmem:[%s1585_s5] sm:$0xff] }
  0x48   : > { %414 = vadd.xlane.f32.xlu1 %v388_v19  ;;  %412 = vadd.xlane.f32.xlu0 %v387_v20  ;;  %v386_v44 = vadd.f32 %v385_v40, %v384_v36 }
  0x49   : > { %v397_v45 = vmul.f32 0.0625, %v377_v41  ;;  %v395_v46 = vadd.f32 %v394_v42, %v393_v38  ;;  %v396_v47 = vmul.f32 0.0625, %v368_v43 }
  0x4a   : > { %v398_v48 = vmul.f32 0.0625, %v386_v44 }
  0x4b   : > { %v399_v49 = vmul.f32 0.0625, %v395_v46  ;;  %v436_v50 = vsel %vm435_vm2, %v397_v45, %v396_v47  ;;  %v519_v46 = vld [vmem:[%s1583_s3] sm:$0xf] }
  0x4c   : > { %v438_v51 = vsel %vm437_vm3, %v398_v48, %v436_v50 }
  0x4d   : > { %v440_v53 = vsel %vm439_vm4, %v399_v49, %v438_v51 }
  0x4e   : > { %1059 = vmatpush3.msk.msra.mxu0 %vm445_vm5, %v440_v53 }
  0x4f   : > { %1061 = vmatmul.mubr.msk.f32.vlgmr.msra.gmra.mrb[0].mxu0 %vm441_vm6, %v424_v52  ;;  %1068 = vmatprep.subr.mxu0 %v1243_v0  ;;  %v740_v52 = vld [vmem:[%s1587_s7] sm:$0xf] }
  0x50   : > { %1070 = vmatprep.mubr.msk.f32.mxu0 %vm1244_vm0, %v1243_v0 }
  0x59   : > { %610 = vperm.xlu1 %1133, %v607_v55  }
  0x5d   : > { %744 = vperm.xlu1 %1133, %v741_v56  }
  0x5e   : > { %428 = vperm.xlu0 %1132, %v425_v54  }
  0x61   : > { %523 = vperm.xlu1 %1133, %v520_v57  }
  0xc9   : > { %v405_v60 = vpop.xlane.xlu1 %404  ;;  %v401_v61 = vpop.xlane.xlu0 %400 }
  0xca   : > { %v418_v13 = vmul.f32 0.0625, %v405_v60  ;;  %v416_v14 = vmul.f32 0.0625, %v401_v61  ;;  %v903_v61 = vsub.s32 2, %v1475_v63 }
  0xcc   : > { %v637_v23 = vrot.slane %v418_v13, %v625_v12  ;;  %v626_v24 = vrot.slane %v416_v14, %v625_v12 }
  0xcd   : > { %v407_v1 = vpop.xlane.xlu1 %406  ;;  %v403_v5 = vpop.xlane.xlu0 %402 }
  0xce   : > { %v419_v7 = vmul.f32 0.0625, %v407_v1  ;;  %v417_v11 = vmul.f32 0.0625, %v403_v5 }
  0xd0   : > { %v641_v19 = vrot.slane %v419_v7, %v630_v6  ;;  %v631_v20 = vrot.slane %v417_v11, %v630_v6  ;;  %v914_v7 = vsub.s32 3, %v1475_v63 }
  0xd1   : > { %v411_v17 = vpop.xlane.xlu1 %410  ;;  %v409_v18 = vpop.xlane.xlu0 %408 }
  0xd2   : > { %v421_v21 = vmul.f32 0.0625, %v411_v17  ;;  %v420_v22 = vmul.f32 0.0625, %v409_v18  ;;  %v642_v29 = vsel %vm632_vm7, %v641_v19, %v637_v23  ;;  %v633_v30 = vsel %vm632_vm7, %v631_v20, %v626_v24 }
  0xd3   : > { %v661_v36 = vsel %vm435_vm2, %v642_v29, %v633_v30 }
  0xd4   : > { %v650_v25 = vrot.slane %v421_v21, %v630_v6  ;;  %v646_v26 = vrot.slane %v420_v22, %v625_v12  ;;  %v1246_v21 = vmov 1966171168  }
  0xd5   : > { %v415_v27 = vpop.xlane.xlu1 %414  ;;  %v413_v28 = vpop.xlane.xlu0 %412  ;;  %v828_v22 = vunpack.c.l.s4 %v1246_v21 }
  0xd6   : > { %v423_v31 = vmul.f32 0.0625, %v415_v27  ;;  %v422_v32 = vmul.f32 0.0625, %v413_v28  ;;  %v651_v33 = vsel %vm632_vm7, %v650_v25, %v646_v26 }
  0xd7   : > { %v662_v38 = vsel %vm437_vm3, %v651_v33, %v661_v36  ;;  %v829_v23 = vunpack.c.0.s8 %v828_v22 }
  0xd8   : > { %v659_v34 = vrot.slane %v423_v31, %v630_v6  ;;  %v655_v35 = vrot.slane %v422_v32, %v625_v12  ;;  %v892_v12 = vsub.s32 1, %v1475_v63 }
  0xd9   : > { %v611_v47 = vpop.permute.xlu1 %610  ;;  %v832_v24 = vsub.s32 %v829_v23, %v1475_v63 }
  0xda   : > { %v660_v37 = vsel %vm632_vm7, %v659_v34, %v655_v35 }
  0xdb   : > { %v663_v40 = vsel %vm439_vm4, %v660_v37, %v662_v38 }
  0xdc   : > { %1069 = vmatpush3.msk.msra.mxu0 %vm445_vm5, %v663_v40 }
  0xdd   : > { %1071 = vmatmul.mubr.msk.f32.vlgmr.msra.gmra.mrb[2].mxu0 %vm441_vm6, %v606_v39  ;;  %v429_v41 = vpop.permute.xlu0 %428  ;;  %v745_v55 = vpop.permute.xlu1 %744 }
  0xe1   : > { %v524_v14 = vpop.permute.xlu1 %523 }
 0x122   : > { %v514_v42 = vpop.f32.mrb[0].mxu0 }
 0x123   : > { %v515_v43 = vadd.f32 %v514_v42, %v429_v41  ;;  %v1062_v44 = vpop.f32.mrb[1].mxu0 }
 0x125   : > { %v518_v45 = vmax.f32 %v515_v43, 0.0 }
 0x127   : > { %1064 = vmatpush3.msra.mxu1 %v518_v45 }
 0x128   : > { %1066 = vmatmul.mubr.msk.f32.vlgmr.msra.gmra.mrb[0].mxu1 %vm526_vm8, %v519_v46  ;;  %1073 = vmatprep.subr.mxu1 %v1243_v0 }
 0x129   : > { %1075 = vmatprep.mubr.msk.f32.mxu1 %vm1244_vm0, %v1243_v0 }
 0x1b0   : > { %v735_v48 = vpop.f32.mrb[2].mxu0 }
 0x1b1   : > { %v736_v49 = vadd.f32 %v735_v48, %v611_v47  ;;  %v1072_v50 = vpop.f32.mrb[3].mxu0 }
 0x1b3   : > { %v739_v51 = vmax.f32 %v736_v49, 0.0 }
 0x1b5   : > { %1074 = vmatpush3.msra.mxu1 %v739_v51 }
 0x1b6   : > { %1076 = vmatmul.mubr.msk.f32.vlgmr.msra.gmra.mrb[2].mxu1 %vm526_vm8, %v740_v52 }
 0x1fb   : > { %v596_v53 = vpop.f32.mrb[0].mxu1 }
 0x1fc   : > { %v1067_v54 = vpop.f32.mrb[1].mxu1  ;;  %v597_v17 = vadd.f32 %v596_v53, %v524_v14 }
 0x1fe   : > { %v1038_v18 = vmul.f32 -1.442695, %v597_v17 }
 0x289   : > { %v816_v56 = vpop.f32.mrb[2].mxu1 }
 0x28a   : > { %v817_v57 = vadd.f32 %v816_v56, %v745_v55  ;;  %v1077_v58 = vpop.f32.mrb[3].mxu1 }
 0x28c   : > { %v1042_v59 = vmul.f32 -1.442695, %v817_v57 }
 0x28e   : > { %1134 = vpow2.f32 %v1042_v59 }
 0x298   : > { %v1135_v0 = vpop.eup %1134 }
 0x299   : > { %v823_v60 = vadd.f32 1.0, %v1135_v0 }
 0x29b   : > { %1136 = vrcp.f32 %v823_v60 }
 0x29c   : > { %1138 = vpow2.f32 %v1038_v18 }
 0x2a5   : > { %v1137_v1 = vpop.eup %1136 }
 0x2a6   : > { %v904_v5 = vrot.slane %v1137_v1, %v903_v61  ;;  %v882_v6 = vrot.slane %v1137_v1, %v853_v62  ;;  %v915_v11 = vrot.slane %v1137_v1, %v914_v7  ;;  %v893_v13 = vrot.slane %v1137_v1, %v892_v12  ;;  %v1139_v19 = vpop.eup %1138 }
 0x2a7   : > { %v603_v20 = vadd.f32 1.0, %v1139_v19 }
 0x2a8   : > { %910 = vbcast.lane.b32.xlu0 %v904_v5, 264  ;;  %884 = vbcast.lane.b32.xlu1 %v882_v6, 256 }
 0x2a9   : > { %1140 = vrcp.f32 %v603_v20 }
 0x2ac   : > { %921 = vbcast.lane.b32.xlu0 %v915_v11, 264  ;;  %888 = vbcast.lane.b32.xlu1 %v882_v6, 264 }
 0x2b0   : > { %895 = vbcast.lane.b32.xlu1 %v893_v13, 256 }
 0x2b3   : > { %v1141_v25 = vpop.eup %1140 }
 0x2b4   : > { %899 = vbcast.lane.b32.xlu1 %v893_v13, 264  ;;  %v833_v26 = vrot.slane %v1141_v25, %v832_v24 }
 0x2b6   : > { %v841_v27 = vrot.slane %v833_v26, %v832_v24  ;;  %v834_v28 = vcombine.high %v833_v26, %v833_v26 }
 0x2b8   : > { %906 = vbcast.lane.b32.xlu1 %v904_v5, 256  ;;  %v849_v29 = vcombine.high %v841_v27, %v841_v27  ;;  %v848_v30 = vrot.slane %v834_v28, %v832_v24  ;;  %v854_v32 = vrot.slane %v841_v27, %v853_v62 }
 0x2ba   : > { %v862_v31 = vrot.slane %v849_v29, %v853_v62  ;;  %v850_v33 = vcombine.high %v848_v30, %v848_v30  ;;  %v871_v35 = vmul.f32 %v854_v32, %v1422_v3  ;;  %v872_v3 = vmul.f32 %v854_v32, %v1432_v8 }
 0x2bb   : > { %v858_v63 = vrot.slane %v848_v30, %v853_v62 }
 0x2bc   : > { %917 = vbcast.lane.b32.xlu1 %v915_v11, 256  ;;  %v876_v34 = vmul.f32 %v862_v31, %v1434_v9  ;;  %v866_v36 = vrot.slane %v850_v33, %v853_v62  ;;  %v875_v49 = vmul.f32 %v862_v31, %v1436_v10 }
 0x2bd   : > { %v873_v45 = vmul.f32 %v858_v63, %v1420_v2  ;;  %v874_v8 = vmul.f32 %v858_v63, %v1424_v4 }
 0x2be   : > { %v878_v9 = vmul.f32 %v866_v36, %v1444_v15  ;;  %v877_v2 = vmul.f32 %v866_v36, %v1446_v16 }
 0x31a   : > { %v911_v37 = vpop.permute.xlu0 %910  ;;  %v885_v38 = vpop.permute.xlu1 %884 }
 0x31b   : > { %v928_v39 = vmul.f32 %v911_v37, %v876_v34  ;;  %v923_v40 = vmul.f32 %v885_v38, %v871_v35 }
 0x31d   : > { %936 = vst.msk [vmem:[%s1505_s26 + $0x28] sm:$0xff] %vm359_vm1, %v928_v39  ;;  %931 = vst.msk [vmem:[%s1505_s26] sm:$0xff] %vm359_vm1, %v923_v40 }
 0x31e   : > { %v922_v41 = vpop.permute.xlu0 %921  ;;  %v889_v42 = vpop.permute.xlu1 %888 }
 0x31f   : > { %v930_v43 = vmul.f32 %v922_v41, %v878_v9  ;;  %v924_v44 = vmul.f32 %v889_v42, %v872_v3 }
 0x321   : > { %938 = vst.msk [vmem:[%s1505_s26 + $0x38] sm:$0xff] %vm359_vm1, %v930_v43  ;;  %932 = vst.msk [vmem:[%s1505_s26 + $0x8] sm:$0xff] %vm359_vm1, %v924_v44 }
 0x322   : > { %v896_v46 = vpop.permute.xlu1 %895 }
 0x323   : > { %v925_v47 = vmul.f32 %v896_v46, %v873_v45 }
 0x325   : > { %933 = vst.msk [vmem:[%s1505_s26 + $0x10] sm:$0xff] %vm359_vm1, %v925_v47 }
 0x326   : > { %v900_v15 = vpop.permute.xlu1 %899 }
 0x327   : > { %v926_v48 = vmul.f32 %v900_v15, %v874_v8 }
 0x329   : > { %934 = vst.msk [vmem:[%s1505_s26 + $0x18] sm:$0xff] %vm359_vm1, %v926_v48 }
 0x32a   : > { %v907_v50 = vpop.permute.xlu1 %906 }
 0x32b   : > { %v927_v51 = vmul.f32 %v907_v50, %v875_v49 }
 0x32d   : > { %935 = vst.msk [vmem:[%s1505_s26 + $0x20] sm:$0xff] %vm359_vm1, %v927_v51 }
 0x32e   : > { %v918_v52 = vpop.permute.xlu1 %917 }
 0x32f   : > { %v929_v4 = vmul.f32 %v918_v52, %v877_v2 }
 0x331   : > { %937 = vst.msk [vmem:[%s1505_s26 + $0x30] sm:$0xff] %vm359_vm1, %v929_v4 }
 0x332   : > { %1185 = shalt.err (!%p1182_p2)
}
 0x333   : > { %s1186_s27 = scalar_lea.hbm %s1532_s20, 1024  ;;  %s1190_s24 = scalar_lea.hbm %s1589_s9, 2048 }
 0x334   : > { %p1187_p4 = scmp.ne.s32.totalorder %s1532_s20, %s1186_s27  ;;  %p1191_p9 = scmp.lt.u32.totalorder %s1532_s20, %s1589_s9 }
 0x335   : > { %p1192_p1 = scmp.lt.u32.totalorder %s1190_s24, %s1186_s27  ;;  %p1194_p6 = scmp.lt.u32.totalorder %s1186_s27, %s1532_s20 }
 0x336   : > { %p1188_p5 = pnand %p1187_p4, %p1596_p11 }
 0x337   : > { %p1193_p3 = por %p1192_p1, %p1191_p9 }
 0x338   : > { %p1189_p7 = pneg %p1188_p5 }
 0x339   : > { %p1195_p12 = por %p1194_p6, %p1193_p3 }
 0x33b   : > { %p1196_p13 = pnand %p1195_p12, %p1189_p7 }
 0x33d   : > { %1199 = shalt.err (!%p1196_p13)
}
 0x33e   : > { %s1248_s28 = smov 128   ;;  %s1249_s16 = smov 8  }
 0x33f   : > { %1080 = dma.vmem_to_hbm [thread:$0]  (%p1596_p11), %s1534_s25, 1024, %s1532_s20, %s940_s13, %s1248_s28, %s1248_s28, %s1249_s16  }
 0x340 PF: > { %s968_s17 = sand.u32 1, %s1226_s30   ;;  %p1597_p8 = scmp.ne.s32.totalorder %s1594_s22, 0 }
 0x341   : > { %p1598_p10 = scmp.ge.s32.totalorder %s1238_s12, 2  ;;  %s969_s27 = scalar_lea.sflag [#allocation4], %s968_s17 }
 0x343   : > { %p1087_p0 = pnand %p1598_p10, %p1597_p8 }
 0x345   : > { %1221 = dma.done.wait (!%p1087_p0), %s969_s27, 1024  }
 0x346   : > { %1223 = vsyncadd (!%p1087_p0), %s969_s27, 4294966272  ;;  %p22_p2 = scmp.ge.s32.totalorder %s1325_s15, 4   ;;  %s1599_s30 = smov %s1230_s10 }
 0x347   : > { %s1600_s10 = smov %s1234_s11  ;;  %s1601_s11 = smov %s1337_s18 }
 0x348   : > { %s1602_s12 = smov %s1325_s15  ;;  %24 = sbr.rel (!%p22_p2) target bundleno = 5 (0x5), region = 101 }
 0x34f   :  { %974 = vsyncpa [#allocation3], 1 }
 0x350   :  { %976 = vsyncpa [#allocation3 + $0x1], 1 }
 0x351   :  { %977 = vsyncpa [#allocation4], 1 }
 0x352   :  { %979 = vsyncpa [#allocation4 + $0x1], 1 }

// kernel: tpu_custom_call.1
= control target key start
LH: loop header
LB: loop body
LE: loop exit
PB: predicated region body
PF: predicated region fallthrough
CT: control target
= control target key end

     0   :  { %8 = vsyncpa [#allocation3], 0  ;;  %s873_s0 = inlined_call_operand.hbm [shape: f32[2,4,16,16], index: 0, kind: input, shape index: {}]   ;;  %s874_s1 = inlined_call_operand.hbm [shape: f32[2,4,1,16], index: 1, kind: output, shape index: {0}]   ;;  %s875_s2 = inlined_call_operand.vmem [shape: f32[2,4,16,1], index: 2, kind: output, shape index: {1}]  }
   0x1   :  { %10 = vsyncpa [#allocation3 + $0x1], 0 }
   0x2   :  { %11 = vsyncpa [#allocation4], 0 }
   0x3   :  { %13 = vsyncpa [#allocation4 + $0x1], 0  ;;  %s676_s9 = smov 0   ;;  %s678_s10 = smov 0  }
   0x4   :  { %s680_s11 = smov 0   ;;  %s682_s12 = smov 0  }
   0x5   :  { %s684_s13 = smov 0   ;;  %s686_s14 = smov 0  }
   0x6 LB: > { %s455_s15 = sadd.s32 4294967295, %s653_s14   ;;  %s456_s16 = sadd.s32 4294967294, %s653_s14   ;;  %s653_s14 = sphi %s686_s14, %s19_s14   ;;  %s649_s13 = sphi %s684_s13, %s890_s13   ;;  %s645_s12 = sphi %s682_s12, %s889_s12   ;;  %s641_s11 = sphi %s680_s11, %s888_s11   ;;  %s637_s10 = sphi %s678_s10, %s887_s10   ;;  %s633_s9 = sphi %s676_s9, %s886_s9  }
   0x7   : > { %s31_s17 = sadd.s32 1, %s649_s13  ;;  %s40_s18 = sadd.s32 1, %s641_s11 }
   0x8   : > { %p33_p0 = scmp.ge.s32.totalorder %s31_s17, 2  ;;  %p47_p1 = scmp.ne.s32.totalorder %s641_s11, %s637_s10 }
   0x9   : > { %p48_p2 = scmp.eq.s32.totalorder %s653_s14, 0  ;;  %p53_p3 = scmp.ne.s32.totalorder %s637_s10, %s633_s9 }
   0xa   : > { %s892_s17 = smov (%p33_p0, %s31_s17), 0  ;;  %p54_p5 = scmp.eq.s32.totalorder %s455_s15, 0 }
   0xb   : > { %p717_p4 = por %p48_p2, %p47_p1  ;;  %s35_s20 = ssub.s32 %s649_s13, %s892_s17 }
   0xc   : > { %p79_p6 = scmp.eq.s32.totalorder %s455_s15, 1  ;;  %p38_p7 = scmp.eq.s32.totalorder %s35_s20, 0 }
   0xd   : > { %p723_p8 = por %p54_p5, %p53_p3  ;;  %p85_p10 = scmp.eq.s32.totalorder %s456_s16, 1 }
   0xe   : > { %p727_p9 = por %p79_p6, %p47_p1  ;;  %p487_p13 = scmp.lt.s32.totalorder %s653_s14, 2 }
   0xf   : > { %s732_s23 = scalar_select %p38_p7, %s641_s11, %s40_s18  }
  0x10   : > { %s879_s22 = scalar_select %p727_p9, 1, 0 }
  0x11   : > { %p734_p11 = por %p85_p10, %p53_p3  ;;  %s133_s25 = sand.u32 1, %s641_s11  }
  0x12   : > { %s459_s26 = sshll.u32 %s133_s25, 6  ;;  %s472_s27 = sshll.u32 %s649_s13, 10 }
  0x13   : > { %s880_s24 = scalar_select %p734_p11, 1, 0 }
  0x14   : > { %s745_s30 = scalar_lea.hbm %s873_s0, %s472_s27  ;;  %s137_s3 = scalar_lea.vmem [#allocation2], %s459_s26 }
  0x15   : > { %s147_s4 = sshll.u32 %s137_s3, 4  ;;  %p751_p0 = pnand %p487_p13, %p717_p4  ;;  %s747_s4 = int_to_ptr.vmem [resolvable:$true] %s147_s4 }
  0x16   : > { %s756_s6 = scalar_lea.sflag [#allocation3], %s133_s25  ;;  %s541_s7 = scalar_lea.hbm %s745_s30, 1024 }
  0x17   : > { %p542_p2 = scmp.ne.s32.totalorder %s745_s30, %s541_s7  ;;  %p543_p3 = pneg %p751_p0 }
  0x18   : > { %s546_s16 = scalar_lea.hbm %s873_s0, 2048  ;;  %p547_p4 = scmp.lt.u32.totalorder %s745_s30, %s873_s0 }
  0x19   : > { %p544_p5 = pnand %p543_p3, %p542_p2  ;;  %p548_p7 = scmp.lt.u32.totalorder %s546_s16, %s541_s7 }
  0x1a   : > { %p550_p13 = scmp.lt.u32.totalorder %s541_s7, %s745_s30 }
  0x1b   : > { %p545_p6 = pneg %p544_p5  ;;  %p549_p10 = por %p548_p7, %p547_p4 }
  0x1d   : > { %p551_p12 = por %p550_p13, %p549_p10 }
  0x1f   : > { %p552_p1 = pnand %p551_p12, %p545_p6 }
  0x21   : > { %555 = shalt.err (!%p552_p1)
}
  0x22   : > { %s556_s20 = scalar_lea.vmem %s747_s4, 1024  ;;  %s655_s25 = smov [#allocation2]  }
  0x23   : > { %p557_p2 = scmp.ne.s32.totalorder %s747_s4, %s556_s20  ;;  %s561_s26 = sshll.u32 %s655_s25, 4  ;;  %s562_s26 = int_to_ptr.vmem [resolvable:$false] %s561_s26 }
  0x24   : > { %s563_s27 = scalar_lea.vmem %s562_s26, 2048  ;;  %p564_p9 = scmp.lt.s32.totalorder %s747_s4, %s562_s26 }
  0x25   : > { %p559_p5 = pnand %p557_p2, %p543_p3  ;;  %p565_p4 = scmp.lt.s32.totalorder %s563_s27, %s556_s20 }
  0x27   : > { %p560_p11 = pneg %p559_p5  ;;  %p566_p7 = por %p565_p4, %p564_p9 }
  0x29   : > { %p567_p10 = pnand %p566_p7, %p560_p11 }
  0x2b   : > { %570 = shalt.err (!%p567_p10)
}
  0x2c   : > { %s656_s28 = smov 128   ;;  %s657_s29 = smov 8  }
  0x2d   : > { %482 = dma.hbm_to_vmem [thread:$0]  (!%p751_p0), %s745_s30, 1024, %s747_s4, %s756_s6, %s656_s28, %s656_s28, %s657_s29  }
  0x2e   : > { %p155_p12 = scmp.lt.s32.totalorder %s653_s14, 3  ;;  %p882_p1 = scmp.ge.s32.totalorder %s653_s14, 1 }
  0x30   : > { %p156_p3 = pnand %p882_p1, %p155_p12 }
  0x31   : > { %s788_s3 = sand.u32 (!%p156_p3), 1, %s637_s10  }
  0x32   : > { %159 = sbr.rel (%p156_p3) target bundleno = 217 (0xd9), region = 24  ;;  %s463_s7 = sshll.u32 (!%p156_p3), %s788_s3, 6 }
  0x33   : > { %s162_s8 = scalar_lea.sflag (!%p156_p3), [#allocation3], %s788_s3  ;;  %s165_s15 = scalar_lea.vmem (!%p156_p3), [#allocation2], %s463_s7 }
  0x39   : > { %624 = dma.done.wait (%p723_p8), %s162_s8, 1024  }
  0x3a   : > { %626 = vsyncadd (%p723_p8), %s162_s8, 4294966272  ;;  %vm217_vm0 = vcmask 130048   ;;  %v211_v0 = vld [vmem:[%s165_s15 + $0x10] sm:$0xff]  ;;  %v209_v1 = vld [vmem:[%s165_s15] sm:$0xff]  ;;  %s464_s21 = sshll.u32 %s788_s3, 2  ;;  %vm258_vm1 = vcmask 122880  }
  0x3b   : > { %v212_v2 = vld [vmem:[%s165_s15 + $0x18] sm:$0xff]  ;;  %v227_v3 = vsel %vm217_vm0, %v211_v0, 0.0  ;;  %v218_v4 = vsel %vm217_vm0, %v209_v1, 0.0  ;;  %v210_v6 = vld [vmem:[%s165_s15 + $0x8] sm:$0xff]  ;;  %v213_v8 = vld [vmem:[%s165_s15 + $0x20] sm:$0xff]  ;;  %s183_s30 = scalar_lea.vmem [#allocation5], %s464_s21 }
  0x3c   : > { %v228_v5 = vsel %vm217_vm0, %v212_v2, 0.0  ;;  %v214_v7 = vld [vmem:[%s165_s15 + $0x28] sm:$0xff]  ;;  %267 = vadd.xlane.f32.xlu1 %v227_v3  ;;  %263 = vadd.xlane.f32.xlu0 %v218_v4  ;;  %v219_v10 = vsel %vm217_vm0, %v210_v6, 0.0  ;;  %v236_v12 = vsel %vm217_vm0, %v213_v8, 0.0  ;;  %v216_v13 = vld [vmem:[%s165_s15 + $0x38] sm:$0xff]  ;;  %v215_v14 = vld [vmem:[%s165_s15 + $0x30] sm:$0xff] }
  0x3d   : > { %v229_v9 = vadd.f32 %v228_v5, %v227_v3  ;;  %v237_v11 = vsel %vm217_vm0, %v214_v7, 0.0  ;;  %v220_v15 = vadd.f32 %v219_v10, %v218_v4  ;;  %v246_v17 = vsel %vm217_vm0, %v216_v13, 0.0  ;;  %s474_s4 = sshll.u32 %s645_s12, 6  ;;  %s322_s5 = sshll.u32 %s183_s30, 4  ;;  %s811_s5 = int_to_ptr.vmem [resolvable:$true] %s322_s5 }
  0x3e   : > { %v238_v16 = vadd.f32 %v237_v11, %v236_v12  ;;  %v245_v18 = vsel %vm217_vm0, %v215_v14, 0.0  ;;  %s809_s18 = scalar_lea.hbm %s874_s1, %s474_s4  ;;  %s297_s19 = scalar_lea.sflag [#allocation4], %s788_s3 }
  0x3f   : > { %v230_v19 = vrot.slane %v229_v9, 4  ;;  %v247_v20 = vadd.f32 %v246_v17, %v245_v18  ;;  %v221_v21 = vrot.slane %v220_v15, 4  ;;  %s571_s20 = scalar_lea.vmem %s811_s5, 64  ;;  %p883_p9 = scmp.ne.s32.totalorder %s879_s22, 0 }
  0x40   : > { %v239_v22 = vrot.slane %v238_v16, 4  ;;  %269 = vadd.xlane.f32.xlu1 %v228_v5  ;;  %265 = vadd.xlane.f32.xlu0 %v219_v10  ;;  %p572_p8 = scmp.ne.s32.totalorder %s811_s5, %s571_s20  ;;  %s658_s25 = smov [#allocation5]  }
  0x41   : > { %v231_v23 = vadd.f32 %v230_v19, %v229_v9  ;;  %v248_v24 = vrot.slane %v247_v20, 4  ;;  %v222_v25 = vadd.f32 %v221_v21, %v220_v15  ;;  %s575_s26 = sshll.u32 %s658_s25, 4  ;;  %s576_s26 = int_to_ptr.vmem [resolvable:$false] %s575_s26 }
  0x42   : > { %v240_v26 = vadd.f32 %v239_v22, %v238_v16  ;;  %p573_p11 = pnand %p572_p8, %p883_p9  ;;  %s577_s27 = scalar_lea.vmem %s576_s26, 128 }
  0x43   : > { %v232_v27 = vrot.slane %v231_v23, 2  ;;  %v249_v28 = vadd.f32 %v248_v24, %v247_v20  ;;  %v223_v29 = vrot.slane %v222_v25, 2  ;;  %p578_p6 = scmp.lt.s32.totalorder %s811_s5, %s576_s26  ;;  %p579_p13 = scmp.lt.s32.totalorder %s577_s27, %s571_s20 }
  0x44   : > { %v241_v30 = vrot.slane %v240_v26, 2  ;;  %273 = vadd.xlane.f32.xlu1 %v237_v11  ;;  %271 = vadd.xlane.f32.xlu0 %v236_v12  ;;  %p574_p0 = pneg %p573_p11 }
  0x45   : > { %v233_v31 = vadd.f32 %v232_v27, %v231_v23  ;;  %v250_v32 = vrot.slane %v249_v28, 2  ;;  %v224_v33 = vadd.f32 %v223_v29, %v222_v25  ;;  %p580_p2 = por %p579_p13, %p578_p6 }
  0x46   : > { %v242_v34 = vadd.f32 %v241_v30, %v240_v26 }
  0x47   : > { %v234_v35 = vrot.slane %v233_v31, 1  ;;  %v251_v36 = vadd.f32 %v250_v32, %v249_v28  ;;  %v225_v37 = vrot.slane %v224_v33, 1  ;;  %p581_p5 = pnand %p580_p2, %p574_p0 }
  0x48   : > { %v243_v38 = vrot.slane %v242_v34, 1  ;;  %277 = vadd.xlane.f32.xlu1 %v246_v17  ;;  %275 = vadd.xlane.f32.xlu0 %v245_v18 }
  0x49   : > { %v235_v39 = vadd.f32 %v234_v35, %v233_v31  ;;  %v252_v40 = vrot.slane %v251_v36, 1  ;;  %v226_v41 = vadd.f32 %v225_v37, %v224_v33 }
  0x4a   : > { %v244_v42 = vadd.f32 %v243_v38, %v242_v34 }
  0x4b   : > { %v255_v43 = vmul.f32 0.0625, %v235_v39  ;;  %v253_v44 = vadd.f32 %v252_v40, %v251_v36  ;;  %v254_v45 = vmul.f32 0.0625, %v226_v41 }
  0x4c   : > { %v256_v46 = vmul.f32 0.0625, %v244_v42 }
  0x4d   : > { %260 = vst.msk [vmem:[%s183_s30 + $0x1] sm:$0x1] %vm258_vm1, %v255_v43  ;;  %v257_v47 = vmul.f32 0.0625, %v253_v44  ;;  %259 = vst.msk [vmem:[%s183_s30] sm:$0x1] %vm258_vm1, %v254_v45 }
  0x4e   : > { %261 = vst.msk [vmem:[%s183_s30 + $0x2] sm:$0x1] %vm258_vm1, %v256_v46 }
  0x4f   : > { %262 = vst.msk [vmem:[%s183_s30 + $0x3] sm:$0x1] %vm258_vm1, %v257_v47 }
  0x50   : > { %584 = shalt.err (!%p581_p5)
}
  0x51   : > { %s585_s28 = scalar_lea.hbm %s809_s18, 64  ;;  %s589_s8 = scalar_lea.hbm %s874_s1, 128 }
  0x52   : > { %p586_p4 = scmp.ne.s32.totalorder %s809_s18, %s585_s28  ;;  %p590_p12 = scmp.lt.u32.totalorder %s809_s18, %s874_s1 }
  0x53   : > { %p591_p1 = scmp.lt.u32.totalorder %s589_s8, %s585_s28  ;;  %p593_p8 = scmp.lt.u32.totalorder %s585_s28, %s809_s18 }
  0x54   : > { %p587_p7 = pnand %p586_p4, %p883_p9 }
  0x55   : > { %p592_p3 = por %p591_p1, %p590_p12 }
  0x56   : > { %p588_p10 = pneg %p587_p7 }
  0x57   : > { %p594_p11 = por %p593_p8, %p592_p3 }
  0x59   : > { %p595_p0 = pnand %p594_p11, %p588_p10 }
  0x5b   : > { %598 = shalt.err (!%p595_p0)
}
  0x5c   : > { %s659_s30 = smov 16   ;;  %s660_s4 = smov 1   ;;  %vm287_vm2 = vcmask 7168  }
  0x5d   : > { %477 = dma.vmem_to_hbm [thread:$0]  (%p883_p9), %s811_s5, 64, %s809_s18, %s297_s19, %s659_s30, %s659_s30, %s660_s4  }
  0x5e   : > { %p199_p6 = scmp.lt.s32.totalorder %s645_s12, 1 }
  0x60   : > { %s894_s12 = smov (!%p199_p6, %s645_s12), 1 }
  0x61   : > { %s473_s6 = sshll.u32 %s894_s12, 6 }
  0x62   : > { %s207_s25 = scalar_lea.vmem %s875_s2, %s473_s6 }
  0xc9   : > { %v268_v48 = vpop.xlane.xlu1 %267  ;;  %v264_v49 = vpop.xlane.xlu0 %263 }
  0xca   : > { %v281_v50 = vmul.f32 0.0625, %v268_v48  ;;  %v279_v51 = vmul.f32 0.0625, %v264_v49 }
  0xcc   : > { %290 = vst.msk [vmem:[%s207_s25 + $0x10] sm:$0xff] %vm287_vm2, %v281_v50  ;;  %288 = vst.msk [vmem:[%s207_s25] sm:$0xff] %vm287_vm2, %v279_v51 }
  0xcd   : > { %v270_v52 = vpop.xlane.xlu1 %269  ;;  %v266_v53 = vpop.xlane.xlu0 %265 }
  0xce   : > { %v282_v54 = vmul.f32 0.0625, %v270_v52  ;;  %v280_v55 = vmul.f32 0.0625, %v266_v53 }
  0xd0   : > { %291 = vst.msk [vmem:[%s207_s25 + $0x18] sm:$0xff] %vm287_vm2, %v282_v54  ;;  %289 = vst.msk [vmem:[%s207_s25 + $0x8] sm:$0xff] %vm287_vm2, %v280_v55 }
  0xd1   : > { %v274_v56 = vpop.xlane.xlu1 %273  ;;  %v272_v57 = vpop.xlane.xlu0 %271 }
  0xd2   : > { %v284_v58 = vmul.f32 0.0625, %v274_v56  ;;  %v283_v59 = vmul.f32 0.0625, %v272_v57 }
  0xd4   : > { %293 = vst.msk [vmem:[%s207_s25 + $0x28] sm:$0xff] %vm287_vm2, %v284_v58  ;;  %292 = vst.msk [vmem:[%s207_s25 + $0x20] sm:$0xff] %vm287_vm2, %v283_v59 }
  0xd5   : > { %v278_v60 = vpop.xlane.xlu1 %277  ;;  %v276_v61 = vpop.xlane.xlu0 %275 }
  0xd6   : > { %v286_v62 = vmul.f32 0.0625, %v278_v60  ;;  %v285_v63 = vmul.f32 0.0625, %v276_v61 }
  0xd8   : > { %295 = vst.msk [vmem:[%s207_s25 + $0x38] sm:$0xff] %vm287_vm2, %v286_v62  ;;  %294 = vst.msk [vmem:[%s207_s25 + $0x30] sm:$0xff] %vm287_vm2, %v285_v63 }
  0xd9 PF: > { %s341_s12 = sand.u32 1, %s633_s9   ;;  %p884_p9 = scmp.ne.s32.totalorder %s880_s24, 0 }
  0xda   : > { %p885_p13 = scmp.ge.s32.totalorder %s653_s14, 2  ;;  %s342_s22 = scalar_lea.sflag [#allocation4], %s341_s12 }
  0xdc   : > { %p484_p2 = pnand %p885_p13, %p884_p9 }
  0xde   : > { %628 = dma.done.wait (!%p484_p2), %s342_s22, 64  }
  0xdf   : > { %630 = vsyncadd (!%p484_p2), %s342_s22, 4294967232  ;;  %s19_s14 = sadd.s32 1, %s653_s14   ;;  %s886_s9 = smov %s637_s10 }
  0xe0   : > { %p16_p5 = scmp.ge.s32.totalorder %s19_s14, 4   ;;  %s887_s10 = smov %s641_s11 }
  0xe1   : > { %s888_s11 = smov %s732_s23  ;;  %s889_s12 = smov %s649_s13 }
  0xe2   : > { %s890_s13 = smov %s892_s17  ;;  %18 = sbr.rel (!%p16_p5) target bundleno = 6 (0x6), region = 81 }
  0xe9   :  { %360 = vsyncpa [#allocation3], 1 }
  0xea   :  { %362 = vsyncpa [#allocation3 + $0x1], 1 }
  0xeb   :  { %363 = vsyncpa [#allocation4], 1 }
  0xec   :  { %365 = vsyncpa [#allocation4 + $0x1], 1 }

</bundles_post_ra>
